<compile_context>
chip_gen: v7x
topology: tpu7x:2x2x1
jax: 0.10.0
libtpu: 0.0.40
codegen_flags: <defaults>
</compile_context>

<pallas_src>
import functools

import jax
import jax.numpy as jnp
from jax.experimental import pallas as pl
from jax.experimental.pallas import tpu as pltpu


_VMEM_LIMIT_BYTES = 48 * 1024 * 1024   # < 64 MiB physical on v7x, ample headroom on v5e/v6e
_MAX_FLAT_TILE = 262144                # flat elems / step (unlabeled path) ~= 32 MiB VMEM
_MAX_POINT_TILE = 131072               # points / step (labeled path)      ~= 16 MiB VMEM


def _round_up(x, m):
    return ((x + m - 1) // m) * m


# --------------------------------------------------------------------------
# Kernel 1: valid_labels=None.  Fully fused |pt - gt| sum over flat (1, 3N).
# --------------------------------------------------------------------------
def _flat_l1_partial_kernel(x_ref, y_ref, out_ref, *, n_flat, tf):
    i = pl.program_id(0)
    diff = jnp.abs(x_ref[...].astype(jnp.float32)
                   - y_ref[...].astype(jnp.float32))            # (1, TF)

    @pl.when(i < pl.num_programs(0) - 1)
    def _():
        # Hot path: block fully in bounds, no mask work at all.
        out_ref[...] = jnp.sum(diff, keepdims=True)

    @pl.when(i == pl.num_programs(0) - 1)
    def _():
        # Cold path: only the last block may be ragged.  jnp.where so that
        # garbage (possibly NaN) tail values never poison the sum.
        idx = i * tf + jax.lax.broadcasted_iota(jnp.int32, diff.shape, 1)
        out_ref[...] = jnp.sum(jnp.where(idx < n_flat, diff, 0.0), keepdims=True)


@functools.partial(jax.jit, static_argnames=("tf",))
def _unlabeled_loss(pt, gt, *, tf):
    n, d = pt.shape
    n_flat = n * d
    x = pt.reshape(1, n_flat)        # free contiguous view, no relayout
    y = gt.reshape(1, n_flat)
    num_blocks = pl.cdiv(n_flat, tf)

    partial_num = pl.pallas_call(
        functools.partial(_flat_l1_partial_kernel, n_flat=n_flat, tf=tf),
        out_shape=jax.ShapeDtypeStruct((num_blocks, 1), jnp.float32),
        grid_spec=pltpu.PrefetchScalarGridSpec(
            num_scalar_prefetch=0,
            grid=(num_blocks,),
            in_specs=[pl.BlockSpec((1, tf), lambda i: (0, i)),
                      pl.BlockSpec((1, tf), lambda i: (0, i))],
            out_specs=pl.BlockSpec((1, 1), lambda i: (i, 0)),
        ),
        compiler_params=pltpu.CompilerParams(
            dimension_semantics=("parallel",),        # shards across v7x cores
            vmem_limit_bytes=_VMEM_LIMIT_BYTES),
    )(x, y)

    return jnp.sum(partial_num) / (n + 1e-6)          # den is statically N


# --------------------------------------------------------------------------
# Kernel 2: labeled path.  Masked reduction over lane-dense (1, N) dist/labels.
# (The L1 distance itself is fused into the wrapper's natural-layout XLA pass,
#  which avoids any relayout of the (N, 3) offsets.)
# --------------------------------------------------------------------------
def _masked_dist_partial_kernel(dist_ref, labels_ref, num_ref, den_ref, *,
                                n_total, tn, valid_labels):
    i = pl.program_id(0)
    dist = dist_ref[...]                               # (1, TN) f32
    lab = labels_ref[...]                              # (1, TN) int

    if len(valid_labels) == 0:
        valid = jnp.zeros(dist.shape, dtype=jnp.bool_)
    else:
        valid = lab == valid_labels[0]
        for v in valid_labels[1:]:
            valid = valid | (lab == v)

    @pl.when(i < pl.num_programs(0) - 1)
    def _():
        # Hot path: one convert feeds both numerator and denominator.
        maskf = valid.astype(jnp.float32)
        num_ref[...] = jnp.sum(dist * maskf, keepdims=True)
        den_ref[...] = jnp.sum(maskf, keepdims=True)

    @pl.when(i == pl.num_programs(0) - 1)
    def _():
        # Cold path: ragged tail; where() keeps garbage tail values (NaN-safe)
        # out of the numerator.
        idx = i * tn + jax.lax.broadcasted_iota(jnp.int32, dist.shape, 1)
        mask = valid & (idx < n_total)
        num_ref[...] = jnp.sum(jnp.where(mask, dist, 0.0), keepdims=True)
        den_ref[...] = jnp.sum(mask.astype(jnp.float32), keepdims=True)


@functools.partial(jax.jit, static_argnames=("tn", "valid_labels"))
def _labeled_loss(pt, gt, labels, *, tn, valid_labels):
    n, d = pt.shape
    # One fused, natural-layout XLA pass: per-point L1 distance, lane-dense.
    dist = jnp.sum(jnp.abs(pt.astype(jnp.float32) - gt.astype(jnp.float32)),
                   axis=-1).reshape(1, n)
    lab2 = labels.reshape(1, n)
    num_blocks = pl.cdiv(n, tn)

    partial_num, partial_den = pl.pallas_call(
        functools.partial(_masked_dist_partial_kernel, n_total=n, tn=tn,
                          valid_labels=valid_labels),
        out_shape=(jax.ShapeDtypeStruct((num_blocks, 1), jnp.float32),
                   jax.ShapeDtypeStruct((num_blocks, 1), jnp.float32)),
        grid_spec=pltpu.PrefetchScalarGridSpec(
            num_scalar_prefetch=0,
            grid=(num_blocks,),
            in_specs=[pl.BlockSpec((1, tn), lambda i: (0, i)),
                      pl.BlockSpec((1, tn), lambda i: (0, i))],
            out_specs=[pl.BlockSpec((1, 1), lambda i: (i, 0)),
                       pl.BlockSpec((1, 1), lambda i: (i, 0))],
        ),
        compiler_params=pltpu.CompilerParams(
            dimension_semantics=("parallel",),
            vmem_limit_bytes=_VMEM_LIMIT_BYTES),
    )(dist, lab2)

    return jnp.sum(partial_num) / (jnp.sum(partial_den) + 1e-6)


class OffsetInstanceLoss:
    """JAX/Pallas port of calo_cluster OffsetInstanceLoss (forward only)."""

    def __init__(self, valid_labels=None, max_tile_points=_MAX_POINT_TILE):
        self.valid_labels = (None if valid_labels is None
                             else tuple(int(v) for v in valid_labels))
        self.max_tile_points = max(int(max_tile_points), 128)

    def __call__(self, pt_offsets, gt_offsets, semantic_labels=None):
        pt = jnp.asarray(pt_offsets)
        gt = jnp.asarray(gt_offsets)
        d = pt.shape[-1]
        pt = pt.reshape(-1, d)
        gt = gt.reshape(-1, d)
        n = pt.shape[0]

        if self.valid_labels is None:
            # Fully fused flat kernel; labels are not needed / not streamed.
            flat = n * d
            cap = min(_round_up(self.max_tile_points * d, 128), _MAX_FLAT_TILE)
            tf = flat if flat <= cap else cap       # single exact block, or 128-aligned tiles
            return _unlabeled_loss(pt, gt, tf=tf)

        if semantic_labels is None:
            raise ValueError(
                "OffsetInstanceLoss: valid_labels is set, so semantic_labels "
                "must be provided.")
        labels = jnp.asarray(semantic_labels).reshape(-1)
        if not jnp.issubdtype(labels.dtype, jnp.integer):
            labels = labels.astype(jnp.int32)

        cap = min(_round_up(self.max_tile_points, 128), _MAX_POINT_TILE)
        tn = n if n <= cap else cap
        return _labeled_loss(pt, gt, labels, tn=tn,
                             valid_labels=self.valid_labels)


def _reference(pt, gt, labels, valid_labels):
    pt_dist = jnp.sum(jnp.abs(pt - gt), axis=-1)
    if valid_labels is not None:
        valid = jnp.any(labels[..., None] == jnp.asarray(valid_labels), axis=-1)
    else:
        valid = jnp.ones_like(labels, dtype=bool)
    validf = valid.reshape(-1).astype(jnp.float32)
    return jnp.sum(pt_dist * validf) / (jnp.sum(validf) + 1e-6)


if __name__ == "__main__":
    key = jax.random.PRNGKey(0)
    k1, k2, k3 = jax.random.split(key, 3)

    N, D = 200, 3          # N points (exercises ragged tails), 3-D offsets
    valid_labels = [1, 2]

    pt_offsets = jax.random.normal(k1, (N, D), jnp.float32)
    gt_offsets = jax.random.normal(k2, (N, D), jnp.float32)
    semantic_labels = jax.random.randint(k3, (N,), 0, 4, jnp.int32)

    ref = _reference(pt_offsets, gt_offsets, semantic_labels, valid_labels)
    ref_none = _reference(pt_offsets, gt_offsets, semantic_labels, None)

    # Labeled path, default tiling (single block).
    loss = OffsetInstanceLoss(valid_labels=valid_labels)(
        pt_offsets, gt_offsets, semantic_labels)
    jax.block_until_ready(loss)
    assert jnp.allclose(loss, ref, rtol=1e-5, atol=1e-5), (loss, ref)

    # valid_labels=None path (fused flat kernel; labels not streamed).
    loss_none = OffsetInstanceLoss(valid_labels=None)(
        pt_offsets, gt_offsets, semantic_labels)
    jax.block_until_ready(loss_none)
    assert jnp.allclose(loss_none, ref_none, rtol=1e-5, atol=1e-5), (loss_none, ref_none)

    # Multi-block grids with ragged last tiles (exercise tail masking + partials).
    loss_small = OffsetInstanceLoss(valid_labels=valid_labels, max_tile_points=128)(
        pt_offsets, gt_offsets, semantic_labels)
    jax.block_until_ready(loss_small)
    assert jnp.allclose(loss_small, ref, rtol=1e-5, atol=1e-5), (loss_small, ref)

    loss_none_small = OffsetInstanceLoss(valid_labels=None, max_tile_points=128)(
        pt_offsets, gt_offsets, semantic_labels)
    jax.block_until_ready(loss_none_small)
    assert jnp.allclose(loss_none_small, ref_none, rtol=1e-5, atol=1e-5), (
        loss_none_small, ref_none)

    print("KERNEL_OK")
</pallas_src>

<mosaic_0001>
module attributes {stable_mosaic.version = 11 : i64} {
  func.func @_masked_dist_partial_kernel(%arg0: i32, %arg1: memref<1x200xf32, #tpu.memory_space<vmem>>, %arg2: memref<1x200xi32, #tpu.memory_space<vmem>>, %arg3: memref<1x1xf32, #tpu.memory_space<vmem>>, %arg4: memref<1x1xf32, #tpu.memory_space<vmem>>) attributes {dimension_semantics = [#tpu.dimension_semantics<parallel>], iteration_bounds = array<i64: 1>, scalar_prefetch = 0 : i64, scratch_operands = 0 : i64, tpu.core_type = #tpu.core_type<tc>, window_params = [{transform_indices = @transform_0, window_bounds = array<i64: 1, 200>}, {transform_indices = @transform_1, window_bounds = array<i64: 1, 200>}, {transform_indices = @transform_2, window_bounds = array<i64: 1, 1>}, {transform_indices = @transform_3, window_bounds = array<i64: 1, 1>}]} {
    %c0 = arith.constant 0 : index
    %c0_0 = arith.constant 0 : index
    %0 = vector.load %arg1[%c0, %c0_0] : memref<1x200xf32, #tpu.memory_space<vmem>>, vector<1x200xf32>
    %c0_1 = arith.constant 0 : index
    %c0_2 = arith.constant 0 : index
    %1 = vector.load %arg2[%c0_1, %c0_2] : memref<1x200xi32, #tpu.memory_space<vmem>>, vector<1x200xi32>
    %c1_i32 = arith.constant 1 : i32
    %2 = vector.broadcast %c1_i32 : i32 to vector<1x200xi32>
    %3 = arith.cmpi eq, %1, %2 : vector<1x200xi32>
    %c2_i32 = arith.constant 2 : i32
    %4 = vector.broadcast %c2_i32 : i32 to vector<1x200xi32>
    %5 = arith.cmpi eq, %1, %4 : vector<1x200xi32>
    %6 = arith.ori %3, %5 : vector<1x200xi1>
    %c0_i32 = arith.constant 0 : i32
    %7 = arith.cmpi slt, %arg0, %c0_i32 : i32
    %8 = arith.extui %7 : i1 to i32
    %c0_i32_3 = arith.constant 0 : i32
    %9 = arith.cmpi ne, %8, %c0_i32_3 : i32
    scf.if %9 {
      %13 = arith.extui %6 : vector<1x200xi1> to vector<1x200xi32>
      %14 = arith.sitofp %13 : vector<1x200xi32> to vector<1x200xf32>
      %15 = arith.mulf %0, %14 : vector<1x200xf32>
      %16 = vector.shape_cast %15 : vector<1x200xf32> to vector<1x1x200xf32>
      %cst = arith.constant dense<0.000000e+00> : vector<1xf32>
      %17 = vector.multi_reduction <add>, %16, %cst [1, 2] : vector<1x1x200xf32> to vector<1xf32>
      %18 = vector.shape_cast %17 : vector<1xf32> to vector<1x1x1xf32>
      %19 = vector.extract %18[0, 0, 0] : f32 from vector<1x1x1xf32>
      %20 = vector.broadcast %19 : f32 to vector<1x1xf32>
      %c0_6 = arith.constant 0 : index
      %c0_7 = arith.constant 0 : index
      %21 = vector.load %arg3[%c0_6, %c0_7] : memref<1x1xf32, #tpu.memory_space<vmem>>, vector<1x1xf32>
      tpu.vector_store %arg3[%c0_6, %c0_7], %20 {strides = array<i32>} : memref<1x1xf32, #tpu.memory_space<vmem>>, vector<1x1xf32>,
      %22 = vector.shape_cast %14 : vector<1x200xf32> to vector<1x1x200xf32>
      %cst_8 = arith.constant dense<0.000000e+00> : vector<1xf32>
      %23 = vector.multi_reduction <add>, %22, %cst_8 [1, 2] : vector<1x1x200xf32> to vector<1xf32>
      %24 = vector.shape_cast %23 : vector<1xf32> to vector<1x1x1xf32>
      %25 = vector.extract %24[0, 0, 0] : f32 from vector<1x1x1xf32>
      %26 = vector.broadcast %25 : f32 to vector<1x1xf32>
      %c0_9 = arith.constant 0 : index
      %c0_10 = arith.constant 0 : index
      %27 = vector.load %arg4[%c0_9, %c0_10] : memref<1x1xf32, #tpu.memory_space<vmem>>, vector<1x1xf32>
      tpu.vector_store %arg4[%c0_9, %c0_10], %26 {strides = array<i32>} : memref<1x1xf32, #tpu.memory_space<vmem>>, vector<1x1xf32>,
    } else {
    }
    %c0_i32_4 = arith.constant 0 : i32
    %10 = arith.cmpi eq, %arg0, %c0_i32_4 : i32
    %11 = arith.extui %10 : i1 to i32
    %c0_i32_5 = arith.constant 0 : i32
    %12 = arith.cmpi ne, %11, %c0_i32_5 : i32
    scf.if %12 {
      %c200_i32 = arith.constant 200 : i32
      %13 = arith.muli %arg0, %c200_i32 : i32
      %14 = tpu.iota {dimensions = array<i32: 1>} : vector<1x200xi32>
      %15 = vector.broadcast %13 : i32 to vector<1x200xi32>
      %16 = arith.addi %15, %14 : vector<1x200xi32>
      %c200_i32_6 = arith.constant 200 : i32
      %17 = vector.broadcast %c200_i32_6 : i32 to vector<1x200xi32>
      %18 = arith.cmpi slt, %16, %17 : vector<1x200xi32>
      %19 = arith.andi %6, %18 : vector<1x200xi1>
      %cst = arith.constant 0.000000e+00 : f32
      %20 = vector.broadcast %cst : f32 to vector<1x200xf32>
      %21 = arith.select %19, %0, %20 : vector<1x200xi1>, vector<1x200xf32>
      %22 = vector.shape_cast %21 : vector<1x200xf32> to vector<1x1x200xf32>
      %cst_7 = arith.constant dense<0.000000e+00> : vector<1xf32>
      %23 = vector.multi_reduction <add>, %22, %cst_7 [1, 2] : vector<1x1x200xf32> to vector<1xf32>
      %24 = vector.shape_cast %23 : vector<1xf32> to vector<1x1x1xf32>
      %25 = vector.extract %24[0, 0, 0] : f32 from vector<1x1x1xf32>
      %26 = vector.broadcast %25 : f32 to vector<1x1xf32>
      %c0_8 = arith.constant 0 : index
      %c0_9 = arith.constant 0 : index
      %27 = vector.load %arg3[%c0_8, %c0_9] : memref<1x1xf32, #tpu.memory_space<vmem>>, vector<1x1xf32>
      tpu.vector_store %arg3[%c0_8, %c0_9], %26 {strides = array<i32>} : memref<1x1xf32, #tpu.memory_space<vmem>>, vector<1x1xf32>,
      %28 = arith.extui %19 : vector<1x200xi1> to vector<1x200xi32>
      %29 = arith.sitofp %28 : vector<1x200xi32> to vector<1x200xf32>
      %30 = vector.shape_cast %29 : vector<1x200xf32> to vector<1x1x200xf32>
      %cst_10 = arith.constant dense<0.000000e+00> : vector<1xf32>
      %31 = vector.multi_reduction <add>, %30, %cst_10 [1, 2] : vector<1x1x200xf32> to vector<1xf32>
      %32 = vector.shape_cast %31 : vector<1xf32> to vector<1x1x1xf32>
      %33 = vector.extract %32[0, 0, 0] : f32 from vector<1x1x1xf32>
      %34 = vector.broadcast %33 : f32 to vector<1x1xf32>
      %c0_11 = arith.constant 0 : index
      %c0_12 = arith.constant 0 : index
      %35 = vector.load %arg4[%c0_11, %c0_12] : memref<1x1xf32, #tpu.memory_space<vmem>>, vector<1x1xf32>
      tpu.vector_store %arg4[%c0_11, %c0_12], %34 {strides = array<i32>} : memref<1x1xf32, #tpu.memory_space<vmem>>, vector<1x1xf32>,
    } else {
    }
    return
  }
  func.func @transform_0(%arg0: i32) -> (i32, i32) {
    %c0_i32 = arith.constant 0 : i32
    %c0_i32_0 = arith.constant 0 : i32
    return %c0_i32, %arg0 : i32, i32
  }
  func.func @transform_1(%arg0: i32) -> (i32, i32) {
    %c0_i32 = arith.constant 0 : i32
    %c0_i32_0 = arith.constant 0 : i32
    return %c0_i32, %arg0 : i32, i32
  }
  func.func @transform_2(%arg0: i32) -> (i32, i32) {
    %c0_i32 = arith.constant 0 : i32
    %c0_i32_0 = arith.constant 0 : i32
    return %arg0, %c0_i32 : i32, i32
  }
  func.func @transform_3(%arg0: i32) -> (i32, i32) {
    %c0_i32 = arith.constant 0 : i32
    %c0_i32_0 = arith.constant 0 : i32
    return %arg0, %c0_i32 : i32, i32
  }
}

</mosaic_0001>

<bundles_post_ra>
// kernel: _labeled_loss.1
= control target key start
LH: loop header
LB: loop body
LE: loop exit
PB: predicated region body
PF: predicated region fallthrough
CT: control target
= control target key end

     0   :  { %9 = vsyncpa [#allocation3], 0  ;;  %v85_v0 = vlaneseq  ;;  %v256_v2 = vmov 1966171168   ;;  %s314_s0 = inlined_call_operand.vmem [shape: f32[1,200], index: 0, kind: input, shape index: {}]   ;;  %s315_s1 = inlined_call_operand.vmem [shape: s32[1,200], index: 1, kind: input, shape index: {}]   ;;  %s316_s2 = inlined_call_operand.hbm [shape: f32[1,1], index: 2, kind: output, shape index: {0}]   ;;  %s317_s3 = inlined_call_operand.hbm [shape: f32[1,1], index: 3, kind: output, shape index: {1}]  }
   0x1   :  { %v97_v3 = vunpack.c.l.s4 %v256_v2 }
   0x2   :  { %v86_v1 = vand.u32 127, %v85_v0  ;;  %v100_v4 = vshrl.u32 %v85_v0, 7 }
   0x3   :  { %10 = vsyncpa [#allocation5], 0  ;;  %v98_v6 = vunpack.c.0.s8 %v97_v3  ;;  %v16_v7 = vld [vmem:[%s315_s1] sm:$0x3]  ;;  %v257_v9 = vmov 0   ;;  %v258_v11 = vmov 1  }
   0x4   :  { %v87_v5 = vadd.s32 128, %v86_v1  ;;  %vm17_vm1 = vcmp.eq.s32.totalorder %v16_v7, 1  ;;  %vm18_vm2 = vcmp.eq.s32.totalorder %v16_v7, 2  ;;  %v15_v15 = vld [vmem:[%s314_s0] sm:$0x3]  ;;  %v116_v16 = vsub.s32 0, %v100_v4 }
   0x5   :  { %v101_v8 = vsub.s32 %v98_v6, %v100_v4  ;;  %vm19_vm3 = vmor %vm17_vm1, %vm18_vm2  ;;  %v120_v17 = vsub.s32 1, %v100_v4  ;;  %vm124_vm6 = vcmask 1040384   ;;  %vm126_vm7 = vcmask 581632   ;;  %s260_s0 = smov [#allocation2]   ;;  %s261_s17 = smov [#allocation4]  }
   0x6   :  { %vm92_vm0 = vcmp.lt.s32.totalorder %v87_v5, 200  ;;  %v259_v19 = vmov 0.0   ;;  %s174_s1 = sshll.u32 %s260_s0, 4  ;;  %vm139_vm8 = vcmask 0   ;;  %s184_s18 = sshll.u32 %s261_s17, 4  ;;  %s175_s1 = int_to_ptr.vmem [resolvable:$true] %s174_s1  ;;  %s185_s18 = int_to_ptr.vmem [resolvable:$true] %s184_s18 }
   0x7   :  { %v94_v10 = vsel %vm92_vm0, 1, %v257_v9  ;;  %s208_s19 = scalar_lea.vmem %s175_s1, 16  ;;  %s212_s20 = scalar_lea.vmem %s175_s1, 32 }
   0x8   :  { %v95_v12 = vcombine.low %v258_v11, %v94_v10  ;;  %p209_p0 = scmp.ne.s32.totalorder %s175_s1, %s208_s19  ;;  %p213_p1 = scmp.lt.s32.totalorder %s175_s1, %s175_s1 }
   0x9   :  { %p214_p2 = scmp.lt.s32.totalorder %s212_s20, %s208_s19 }
   0xa   :  { %v102_v13 = vrot.slane %v95_v12, %v101_v8 }
   0xb   :  { %p215_p3 = por %p214_p2, %p213_p1 }
   0xc   :  { %v109_v14 = vrot.slane %v102_v13, %v101_v8 }
   0xd   :  { %p216_p4 = pnand %p215_p3, %p209_p0 }
   0xe   :  { %vm110_vm4 = vcmp.ne.s32.totalorder %v109_v14, 0 }
   0xf   :  { %vm111_vm5 = vmand %vm19_vm3, %vm110_vm4 }
  0x10   :  { %v112_v18 = vsel %vm111_vm5, %v15_v15, 0.0  ;;  %v197_v20 = vsel %vm111_vm5, 1.0, %v259_v19 }
  0x11   :  { %v117_v21 = vrot.slane %v112_v18, %v116_v16  ;;  %v121_v22 = vrot.slane %v112_v18, %v120_v17  ;;  %v147_v23 = vrot.slane %v197_v20, %v116_v16  ;;  %v151_v24 = vrot.slane %v197_v20, %v120_v17 }
  0x13   :  { %v125_v25 = vsel %vm124_vm6, %v117_v21, 0.0  ;;  %v127_v26 = vsel %vm126_vm7, %v121_v22, 0.0  ;;  %v154_v27 = vsel %vm124_vm6, %v147_v23, 0.0  ;;  %v155_v28 = vsel %vm126_vm7, %v151_v24, 0.0 }
  0x14   :  { %v128_v29 = vadd.f32 %v127_v26, %v125_v25  ;;  %v156_v30 = vadd.f32 %v155_v28, %v154_v27 }
  0x16   :  { %129 = vadd.xlane.f32.xlu0 %v128_v29 }
  0x1a   :  { %157 = vadd.xlane.f32.xlu0 %v156_v30 }
  0xa3   :  { %v130_v31 = vpop.xlane.xlu0 %129 }
  0xa4   :  { %v131_v32 = vrot.slane %v130_v31, 4 }
  0xa6   :  { %v132_v33 = vadd.f32 %v131_v32, %v130_v31 }
  0xa7   :  { %v158_v34 = vpop.xlane.xlu0 %157 }
  0xa8   :  { %v133_v35 = vrot.slane %v132_v33, 2  ;;  %v159_v36 = vrot.slane %v158_v34, 4 }
  0xaa   :  { %v160_v37 = vadd.f32 %v159_v36, %v158_v34  ;;  %v134_v38 = vadd.f32 %v133_v35, %v132_v33 }
  0xac   :  { %v161_v39 = vrot.slane %v160_v37, 2  ;;  %v135_v40 = vrot.slane %v134_v38, 1 }
  0xae   :  { %v162_v41 = vadd.f32 %v161_v39, %v160_v37  ;;  %v136_v42 = vadd.f32 %v135_v40, %v134_v38 }
  0xb0   :  { %198 = vpush %v136_v42  ;;  %v163_v43 = vrot.slane %v162_v41, 1 }
  0xb2   :  { %v164_v44 = vadd.f32 %v163_v43, %v162_v41 }
  0xb4   :  { %200 = vpush %v164_v44 }
  0xe1   :  { %s199_s16 = spop %198 }
  0xe2   :  { %v138_v45 = vstv %s199_s16 }
  0xe3   :  { %140 = vst.msk [vmem:[#allocation2] sm:$0x1] %vm139_vm8, %v138_v45 }
  0xe4   :  { %219 = shalt.err (!%p216_p4)
}
  0xe5   :  { %s220_s23 = scalar_lea.hbm %s316_s2, 16 }
  0xe6   :  { %p221_p5 = scmp.ne.s32.totalorder %s316_s2, %s220_s23  ;;  %p224_p6 = scmp.lt.u32.totalorder %s220_s23, %s316_s2 }
  0xe8   :  { %p226_p7 = pnand %p224_p6, %p221_p5 }
  0xea   :  { %229 = shalt.err (!%p226_p7)
}
  0xeb   :  { %177 = dma.vmem_to_hbm [thread:$0]  %s175_s1, 16, %s316_s2, [#allocation3]  }
  0xec   :  { %s201_s30 = spop %200  ;;  %s230_s4 = scalar_lea.vmem %s185_s18, 16 }
  0xed   :  { %v166_v46 = vstv %s201_s30  ;;  %p231_p8 = scmp.ne.s32.totalorder %s185_s18, %s230_s4  ;;  %s234_s5 = scalar_lea.vmem %s185_s18, 32 }
  0xee   :  { %167 = vst.msk [vmem:[#allocation4] sm:$0x1] %vm139_vm8, %v166_v46  ;;  %p235_p9 = scmp.lt.s32.totalorder %s185_s18, %s185_s18  ;;  %p236_p10 = scmp.lt.s32.totalorder %s234_s5, %s230_s4 }
  0xf0   :  { %p237_p11 = por %p236_p10, %p235_p9 }
  0xf2   :  { %p238_p12 = pnand %p237_p11, %p231_p8 }
  0xf4   :  { %241 = shalt.err (!%p238_p12)
}
  0xf5   :  { %s242_s8 = scalar_lea.hbm %s317_s3, 16 }
  0xf6   :  { %p243_p13 = scmp.ne.s32.totalorder %s317_s3, %s242_s8  ;;  %p246_p0 = scmp.lt.u32.totalorder %s242_s8, %s317_s3 }
  0xf8   :  { %p248_p1 = pnand %p246_p0, %p243_p13 }
  0xfa   :  { %251 = shalt.err (!%p248_p1)
}
  0xfb   :  { %187 = dma.vmem_to_hbm [thread:$0]  %s185_s18, 16, %s317_s3, [#allocation5]  }
  0xfc   :  { %252 = dma.done.wait [#allocation3], 16  }
  0xfd   :  { %253 = vsyncadd [#allocation3], 4294967280 }
  0xfe   :  { %254 = dma.done.wait [#allocation5], 16  }
  0xff   :  { %255 = vsyncadd [#allocation5], 4294967280 }
 0x100   :  { %194 = vsyncpa [#allocation3], 1 }
 0x101   :  { %195 = vsyncpa [#allocation5], 1 }

</bundles_post_ra>
